<compile_context>
chip_gen: v7x
topology: tpu7x:2x2x1
jax: 0.10.0
libtpu: 0.0.40
codegen_flags: <defaults>
</compile_context>

<pallas_src>
import functools

import jax
import jax.numpy as jnp
from jax.experimental import pallas as pl
from jax.experimental.pallas import tpu as pltpu

LOG_SIG_MAX = 2.0
LOG_SIG_MIN = -20.0


def _round_up(x, m):
    return ((x + m - 1) // m) * m


# ----------------------------------------------------------------------------
# Kernel
# ----------------------------------------------------------------------------
def _gaussian_feature_kernel(s_ref, a_ref, w1s_ref, w1a_ref, b1_ref,
                             w2_ref, b2_ref, wm_ref, bm_ref, ws_ref, bs_ref,
                             mean_ref, log_std_ref, *, compute_dtype):
    # Fused concat: x @ W1 == state @ W1[:S] + action @ W1[S:].
    s = s_ref[...].astype(compute_dtype)
    a = a_ref[...].astype(compute_dtype)
    z = (jnp.dot(s, w1s_ref[...], preferred_element_type=jnp.float32)
         + jnp.dot(a, w1a_ref[...], preferred_element_type=jnp.float32)
         + b1_ref[...])
    z = jnp.maximum(z, 0.0)                      # f32 epilogue (v5e-friendly)

    z = jnp.dot(z.astype(compute_dtype), w2_ref[...],
                preferred_element_type=jnp.float32) + b2_ref[...]
    z = jnp.maximum(z, 0.0)
    zc = z.astype(compute_dtype)

    # Two heads, stored directly to their own outputs (no wrapper slicing).
    mean = jnp.dot(zc, wm_ref[...],
                   preferred_element_type=jnp.float32) + bm_ref[...]
    log_std = jnp.dot(zc, ws_ref[...],
                      preferred_element_type=jnp.float32) + bs_ref[...]
    log_std = jnp.clip(log_std, LOG_SIG_MIN, LOG_SIG_MAX)

    mean_ref[...] = mean.astype(mean_ref.dtype)
    log_std_ref[...] = log_std.astype(log_std_ref.dtype)


# ----------------------------------------------------------------------------
# Wrapper
# ----------------------------------------------------------------------------
def _vmem_estimate_bytes(TB, S, A, H, F, out_bytes):
    io = 2 * TB * (S + A) * 4                 # double-buffered input tiles
    io += 2 * 2 * TB * F * out_bytes          # two double-buffered output tiles
    w = 2 * (((S + A) * H + H * H + 2 * H * F) * 2 + (2 * H + 2 * F) * 4)
    act = 3 * TB * H * 4 + TB * H * 2 + 2 * TB * F * 4   # live intermediates
    return io + w + act


def gaussian_feature_forward(state, action, prep, *, block_b=2048,
                             compute_dtype=jnp.bfloat16,
                             out_dtype=jnp.float32):
    """state: [B, S] f32, action: [B, A] f32, prep: prepare_params() output."""
    B, S = state.shape
    A = action.shape[1]
    H = prep["w2"].shape[0]
    F = prep["wm"].shape[1]

    # Very small batches: pad to one sublane (8 rows), negligible cost.
    Bp = B
    if B < 8:
        pad = 8 - B
        state = jnp.pad(state, ((0, pad), (0, 0)))
        action = jnp.pad(action, ((0, pad), (0, 0)))
        Bp = 8

    # Batch tile: big (amortize per-step overhead), but keep >= 2 grid steps
    # when possible so v7x can shard the batch axis over both TensorCores.
    TB = _round_up(pl.cdiv(Bp, 2), 8)
    TB = max(8, min(block_b, TB))
    grid = (pl.cdiv(Bp, TB),)                 # ragged last block is masked

    out_bytes = jnp.dtype(out_dtype).itemsize
    vmem_limit = min(max(int(_vmem_estimate_bytes(TB, S, A, H, F, out_bytes)
                             * 1.25) + (2 << 20), 16 << 20), 56 << 20)

    kernel = functools.partial(_gaussian_feature_kernel,
                               compute_dtype=compute_dtype)

    tiled = lambda i: (i, 0)          # batch-tiled activations / outputs
    rep = lambda i: (0, 0)            # weights & biases: resident, replicated

    mean, log_std = pl.pallas_call(
        kernel,
        grid=grid,
        in_specs=[
            pl.BlockSpec((TB, S), tiled),
            pl.BlockSpec((TB, A), tiled),
            pl.BlockSpec(prep["w1s"].shape, rep),
            pl.BlockSpec(prep["w1a"].shape, rep),
            pl.BlockSpec(prep["b1"].shape, rep),
            pl.BlockSpec(prep["w2"].shape, rep),
            pl.BlockSpec(prep["b2"].shape, rep),
            pl.BlockSpec(prep["wm"].shape, rep),
            pl.BlockSpec(prep["bm"].shape, rep),
            pl.BlockSpec(prep["ws"].shape, rep),
            pl.BlockSpec(prep["bs"].shape, rep),
        ],
        out_specs=(
            pl.BlockSpec((TB, F), tiled),
            pl.BlockSpec((TB, F), tiled),
        ),
        out_shape=(
            jax.ShapeDtypeStruct((Bp, F), out_dtype),
            jax.ShapeDtypeStruct((Bp, F), out_dtype),
        ),
        compiler_params=pltpu.CompilerParams(
            dimension_semantics=("parallel",),
            vmem_limit_bytes=vmem_limit),
    )(state, action, prep["w1s"], prep["w1a"], prep["b1"],
      prep["w2"], prep["b2"], prep["wm"], prep["bm"], prep["ws"], prep["bs"])

    if Bp != B:                        # only for the tiny B < 8 fallback
        mean, log_std = mean[:B], log_std[:B]
    return mean, log_std


# ----------------------------------------------------------------------------
# Parameters (PyTorch nn.Linear-style init, weights stored [in, out])
# ----------------------------------------------------------------------------
def init_params(key, state_dim, action_dim, hidden_dim, feature_dim):
    def linear(k, fan_in, fan_out):
        kw, kb = jax.random.split(k)
        bound = 1.0 / jnp.sqrt(jnp.float32(fan_in))
        w = jax.random.uniform(kw, (fan_in, fan_out), jnp.float32, -bound, bound)
        b = jax.random.uniform(kb, (1, fan_out), jnp.float32, -bound, bound)
        return w, b

    k1, k2, k3, k4 = jax.random.split(key, 4)
    in_dim = state_dim + action_dim
    w1, b1 = linear(k1, in_dim, hidden_dim)
    w2, b2 = linear(k2, hidden_dim, hidden_dim)
    wm, bm = linear(k3, hidden_dim, feature_dim)
    ws, bs = linear(k4, hidden_dim, feature_dim)
    return dict(w1=w1, b1=b1, w2=w2, b2=b2, wm=wm, bm=bm, ws=ws, bs=bs)


def prepare_params(params, state_dim, compute_dtype=jnp.bfloat16):
    """One-time transforms: split W1 for the fused concat and pre-cast matmul
    weights to the MXU compute dtype.  Biases stay f32 (added into the f32
    accumulator)."""
    w1 = params["w1"]
    return dict(
        w1s=w1[:state_dim].astype(compute_dtype),
        w1a=w1[state_dim:].astype(compute_dtype),
        b1=params["b1"],
        w2=params["w2"].astype(compute_dtype),
        b2=params["b2"],
        wm=params["wm"].astype(compute_dtype),
        bm=params["bm"],
        ws=params["ws"].astype(compute_dtype),
        bs=params["bs"],
    )


# ----------------------------------------------------------------------------
# References
# ----------------------------------------------------------------------------
def reference_forward_f32(state, action, p):
    x = jnp.concatenate([state, action], axis=-1)
    z = jax.nn.relu(x @ p["w1"] + p["b1"])
    z = jax.nn.relu(z @ p["w2"] + p["b2"])
    mean = z @ p["wm"] + p["bm"]
    log_std = jnp.clip(z @ p["ws"] + p["bs"], LOG_SIG_MIN, LOG_SIG_MAX)
    return mean, log_std


def reference_forward_matched(state, action, prep, compute_dtype=jnp.bfloat16):
    """Same arithmetic path as the kernel (bf16 matmul inputs, f32 accum)."""
    def mm(x, w):
        return jnp.dot(x.astype(compute_dtype), w,
                       preferred_element_type=jnp.float32)
    z = jnp.maximum(mm(state, prep["w1s"]) + mm(action, prep["w1a"])
                    + prep["b1"], 0.0)
    z = jnp.maximum(mm(z, prep["w2"]) + prep["b2"], 0.0)
    mean = mm(z, prep["wm"]) + prep["bm"]
    log_std = jnp.clip(mm(z, prep["ws"]) + prep["bs"],
                       LOG_SIG_MIN, LOG_SIG_MAX)
    return mean, log_std


# ----------------------------------------------------------------------------
if __name__ == "__main__":
    # Small but lane-friendly shapes (each head output = 128 lanes).
    batch, state_dim, action_dim = 16, 8, 8
    hidden_dim, feature_dim = 128, 128

    key = jax.random.PRNGKey(0)
    kp, ks, ka = jax.random.split(key, 3)
    params = init_params(kp, state_dim, action_dim, hidden_dim, feature_dim)
    prep = prepare_params(params, state_dim)

    state = jax.random.normal(ks, (batch, state_dim), jnp.float32)
    action = jax.random.normal(ka, (batch, action_dim), jnp.float32)

    mean, log_std = gaussian_feature_forward(state, action, prep)
    jax.block_until_ready((mean, log_std))

    # Tight check vs. a reference with the same bf16-input / f32-accum path.
    m_ref, ls_ref = reference_forward_matched(state, action, prep)
    assert jnp.allclose(mean, m_ref, atol=2e-3, rtol=2e-3)
    assert jnp.allclose(log_std, ls_ref, atol=2e-3, rtol=2e-3)

    # Loose sanity check vs. the pure-f32 PyTorch-equivalent math.
    m32, ls32 = reference_forward_f32(state, action, params)
    assert jnp.allclose(mean, m32, atol=1e-1, rtol=1e-1)
    assert jnp.allclose(log_std, ls32, atol=1e-1, rtol=1e-1)

    assert mean.shape == (batch, feature_dim)
    assert log_std.shape == (batch, feature_dim)
    assert float(jnp.max(log_std)) <= LOG_SIG_MAX + 1e-6
    assert float(jnp.min(log_std)) >= LOG_SIG_MIN - 1e-6

    print("KERNEL_OK")
</pallas_src>

<mosaic_0001>
module attributes {stable_mosaic.version = 11 : i64} {
  func.func @_gaussian_feature_kernel(%arg0: i32, %arg1: memref<8x8xf32, #tpu.memory_space<vmem>>, %arg2: memref<8x8xf32, #tpu.memory_space<vmem>>, %arg3: memref<8x128xbf16, #tpu.memory_space<vmem>>, %arg4: memref<8x128xbf16, #tpu.memory_space<vmem>>, %arg5: memref<1x128xf32, #tpu.memory_space<vmem>>, %arg6: memref<128x128xbf16, #tpu.memory_space<vmem>>, %arg7: memref<1x128xf32, #tpu.memory_space<vmem>>, %arg8: memref<128x128xbf16, #tpu.memory_space<vmem>>, %arg9: memref<1x128xf32, #tpu.memory_space<vmem>>, %arg10: memref<128x128xbf16, #tpu.memory_space<vmem>>, %arg11: memref<1x128xf32, #tpu.memory_space<vmem>>, %arg12: memref<8x128xf32, #tpu.memory_space<vmem>>, %arg13: memref<8x128xf32, #tpu.memory_space<vmem>>) attributes {dimension_semantics = [#tpu.dimension_semantics<parallel>], iteration_bounds = array<i64: 2>, scalar_prefetch = 0 : i64, scratch_operands = 0 : i64, tpu.core_type = #tpu.core_type<tc>, window_params = [{transform_indices = @transform_0, window_bounds = array<i64: 8, 8>}, {transform_indices = @transform_1, window_bounds = array<i64: 8, 8>}, {pipeline_mode = #tpu.pipeline_mode<synchronous>, transform_indices = @transform_2, window_bounds = array<i64: 8, 128>}, {pipeline_mode = #tpu.pipeline_mode<synchronous>, transform_indices = @transform_3, window_bounds = array<i64: 8, 128>}, {pipeline_mode = #tpu.pipeline_mode<synchronous>, transform_indices = @transform_4, window_bounds = array<i64: 1, 128>}, {pipeline_mode = #tpu.pipeline_mode<synchronous>, transform_indices = @transform_5, window_bounds = array<i64: 128, 128>}, {pipeline_mode = #tpu.pipeline_mode<synchronous>, transform_indices = @transform_6, window_bounds = array<i64: 1, 128>}, {pipeline_mode = #tpu.pipeline_mode<synchronous>, transform_indices = @transform_7, window_bounds = array<i64: 128, 128>}, {pipeline_mode = #tpu.pipeline_mode<synchronous>, transform_indices = @transform_8, window_bounds = array<i64: 1, 128>}, {pipeline_mode = #tpu.pipeline_mode<synchronous>, transform_indices = @transform_9, window_bounds = array<i64: 128, 128>}, {pipeline_mode = #tpu.pipeline_mode<synchronous>, transform_indices = @transform_10, window_bounds = array<i64: 1, 128>}, {transform_indices = @transform_11, window_bounds = array<i64: 8, 128>}, {transform_indices = @transform_12, window_bounds = array<i64: 8, 128>}]} {
    %c0 = arith.constant 0 : index
    %c0_0 = arith.constant 0 : index
    %0 = vector.load %arg1[%c0, %c0_0] : memref<8x8xf32, #tpu.memory_space<vmem>>, vector<8x8xf32>
    %1 = arith.truncf %0 : vector<8x8xf32> to vector<8x8xbf16>
    %c0_1 = arith.constant 0 : index
    %c0_2 = arith.constant 0 : index
    %2 = vector.load %arg2[%c0_1, %c0_2] : memref<8x8xf32, #tpu.memory_space<vmem>>, vector<8x8xf32>
    %3 = arith.truncf %2 : vector<8x8xf32> to vector<8x8xbf16>
    %c0_3 = arith.constant 0 : index
    %c0_4 = arith.constant 0 : index
    %4 = vector.load %arg3[%c0_3, %c0_4] : memref<8x128xbf16, #tpu.memory_space<vmem>>, vector<8x128xbf16>
    %cst = arith.constant dense<0.000000e+00> : vector<8x128xf32>
    %5 = tpu.matmul %1, %4, %cst {dimension_numbers = #tpu.dot_dimension_numbers<[1], [0], [0], [1], [0, 0, 1, 1], [], []>} : vector<8x8xbf16>, vector<8x128xbf16>, vector<8x128xf32> -> vector<8x128xf32>
    %c0_5 = arith.constant 0 : index
    %c0_6 = arith.constant 0 : index
    %6 = vector.load %arg4[%c0_5, %c0_6] : memref<8x128xbf16, #tpu.memory_space<vmem>>, vector<8x128xbf16>
    %cst_7 = arith.constant dense<0.000000e+00> : vector<8x128xf32>
    %7 = tpu.matmul %3, %6, %cst_7 {dimension_numbers = #tpu.dot_dimension_numbers<[1], [0], [0], [1], [0, 0, 1, 1], [], []>} : vector<8x8xbf16>, vector<8x128xbf16>, vector<8x128xf32> -> vector<8x128xf32>
    %8 = arith.addf %5, %7 : vector<8x128xf32>
    %c0_8 = arith.constant 0 : index
    %c0_9 = arith.constant 0 : index
    %9 = vector.load %arg5[%c0_8, %c0_9] : memref<1x128xf32, #tpu.memory_space<vmem>>, vector<1x128xf32>
    %10 = vector.broadcast %9 : vector<1x128xf32> to vector<8x128xf32>
    %11 = arith.addf %8, %10 : vector<8x128xf32>
    %cst_10 = arith.constant 0.000000e+00 : f32
    %12 = vector.broadcast %cst_10 : f32 to vector<8x128xf32>
    %13 = arith.maximumf %11, %12 : vector<8x128xf32>
    %14 = arith.truncf %13 : vector<8x128xf32> to vector<8x128xbf16>
    %c0_11 = arith.constant 0 : index
    %c0_12 = arith.constant 0 : index
    %15 = vector.load %arg6[%c0_11, %c0_12] : memref<128x128xbf16, #tpu.memory_space<vmem>>, vector<128x128xbf16>
    %cst_13 = arith.constant dense<0.000000e+00> : vector<8x128xf32>
    %16 = tpu.matmul %14, %15, %cst_13 {dimension_numbers = #tpu.dot_dimension_numbers<[1], [0], [0], [1], [0, 0, 1, 1], [], []>} : vector<8x128xbf16>, vector<128x128xbf16>, vector<8x128xf32> -> vector<8x128xf32>
    %c0_14 = arith.constant 0 : index
    %c0_15 = arith.constant 0 : index
    %17 = vector.load %arg7[%c0_14, %c0_15] : memref<1x128xf32, #tpu.memory_space<vmem>>, vector<1x128xf32>
    %18 = vector.broadcast %17 : vector<1x128xf32> to vector<8x128xf32>
    %19 = arith.addf %16, %18 : vector<8x128xf32>
    %cst_16 = arith.constant 0.000000e+00 : f32
    %20 = vector.broadcast %cst_16 : f32 to vector<8x128xf32>
    %21 = arith.maximumf %19, %20 : vector<8x128xf32>
    %22 = arith.truncf %21 : vector<8x128xf32> to vector<8x128xbf16>
    %c0_17 = arith.constant 0 : index
    %c0_18 = arith.constant 0 : index
    %23 = vector.load %arg8[%c0_17, %c0_18] : memref<128x128xbf16, #tpu.memory_space<vmem>>, vector<128x128xbf16>
    %cst_19 = arith.constant dense<0.000000e+00> : vector<8x128xf32>
    %24 = tpu.matmul %22, %23, %cst_19 {dimension_numbers = #tpu.dot_dimension_numbers<[1], [0], [0], [1], [0, 0, 1, 1], [], []>} : vector<8x128xbf16>, vector<128x128xbf16>, vector<8x128xf32> -> vector<8x128xf32>
    %c0_20 = arith.constant 0 : index
    %c0_21 = arith.constant 0 : index
    %25 = vector.load %arg9[%c0_20, %c0_21] : memref<1x128xf32, #tpu.memory_space<vmem>>, vector<1x128xf32>
    %26 = vector.broadcast %25 : vector<1x128xf32> to vector<8x128xf32>
    %27 = arith.addf %24, %26 : vector<8x128xf32>
    %c0_22 = arith.constant 0 : index
    %c0_23 = arith.constant 0 : index
    %28 = vector.load %arg10[%c0_22, %c0_23] : memref<128x128xbf16, #tpu.memory_space<vmem>>, vector<128x128xbf16>
    %cst_24 = arith.constant dense<0.000000e+00> : vector<8x128xf32>
    %29 = tpu.matmul %22, %28, %cst_24 {dimension_numbers = #tpu.dot_dimension_numbers<[1], [0], [0], [1], [0, 0, 1, 1], [], []>} : vector<8x128xbf16>, vector<128x128xbf16>, vector<8x128xf32> -> vector<8x128xf32>
    %c0_25 = arith.constant 0 : index
    %c0_26 = arith.constant 0 : index
    %30 = vector.load %arg11[%c0_25, %c0_26] : memref<1x128xf32, #tpu.memory_space<vmem>>, vector<1x128xf32>
    %31 = vector.broadcast %30 : vector<1x128xf32> to vector<8x128xf32>
    %32 = arith.addf %29, %31 : vector<8x128xf32>
    %cst_27 = arith.constant -2.000000e+01 : f32
    %cst_28 = arith.constant 2.000000e+00 : f32
    %33 = vector.broadcast %cst_27 : f32 to vector<8x128xf32>
    %34 = arith.maximumf %33, %32 : vector<8x128xf32>
    %35 = vector.broadcast %cst_28 : f32 to vector<8x128xf32>
    %36 = arith.minimumf %35, %34 : vector<8x128xf32>
    %c0_29 = arith.constant 0 : index
    %c0_30 = arith.constant 0 : index
    %37 = vector.load %arg12[%c0_29, %c0_30] : memref<8x128xf32, #tpu.memory_space<vmem>>, vector<8x128xf32>
    tpu.vector_store %arg12[%c0_29, %c0_30], %27 {strides = array<i32>} : memref<8x128xf32, #tpu.memory_space<vmem>>, vector<8x128xf32>,
    %c0_31 = arith.constant 0 : index
    %c0_32 = arith.constant 0 : index
    %38 = vector.load %arg13[%c0_31, %c0_32] : memref<8x128xf32, #tpu.memory_space<vmem>>, vector<8x128xf32>
    tpu.vector_store %arg13[%c0_31, %c0_32], %36 {strides = array<i32>} : memref<8x128xf32, #tpu.memory_space<vmem>>, vector<8x128xf32>,
    return
  }
  func.func @transform_0(%arg0: i32) -> (i32, i32) {
    %c0_i32 = arith.constant 0 : i32
    %c0_i32_0 = arith.constant 0 : i32
    return %arg0, %c0_i32 : i32, i32
  }
  func.func @transform_1(%arg0: i32) -> (i32, i32) {
    %c0_i32 = arith.constant 0 : i32
    %c0_i32_0 = arith.constant 0 : i32
    return %arg0, %c0_i32 : i32, i32
  }
  func.func @transform_2(%arg0: i32) -> (i32, i32) {
    %c0_i32 = arith.constant 0 : i32
    %c0_i32_0 = arith.constant 0 : i32
    %c0_i32_1 = arith.constant 0 : i32
    return %c0_i32, %c0_i32_0 : i32, i32
  }
  func.func @transform_3(%arg0: i32) -> (i32, i32) {
    %c0_i32 = arith.constant 0 : i32
    %c0_i32_0 = arith.constant 0 : i32
    %c0_i32_1 = arith.constant 0 : i32
    return %c0_i32, %c0_i32_0 : i32, i32
  }
  func.func @transform_4(%arg0: i32) -> (i32, i32) {
    %c0_i32 = arith.constant 0 : i32
    %c0_i32_0 = arith.constant 0 : i32
    %c0_i32_1 = arith.constant 0 : i32
    return %c0_i32, %c0_i32_0 : i32, i32
  }
  func.func @transform_5(%arg0: i32) -> (i32, i32) {
    %c0_i32 = arith.constant 0 : i32
    %c0_i32_0 = arith.constant 0 : i32
    %c0_i32_1 = arith.constant 0 : i32
    return %c0_i32, %c0_i32_0 : i32, i32
  }
  func.func @transform_6(%arg0: i32) -> (i32, i32) {
    %c0_i32 = arith.constant 0 : i32
    %c0_i32_0 = arith.constant 0 : i32
    %c0_i32_1 = arith.constant 0 : i32
    return %c0_i32, %c0_i32_0 : i32, i32
  }
  func.func @transform_7(%arg0: i32) -> (i32, i32) {
    %c0_i32 = arith.constant 0 : i32
    %c0_i32_0 = arith.constant 0 : i32
    %c0_i32_1 = arith.constant 0 : i32
    return %c0_i32, %c0_i32_0 : i32, i32
  }
  func.func @transform_8(%arg0: i32) -> (i32, i32) {
    %c0_i32 = arith.constant 0 : i32
    %c0_i32_0 = arith.constant 0 : i32
    %c0_i32_1 = arith.constant 0 : i32
    return %c0_i32, %c0_i32_0 : i32, i32
  }
  func.func @transform_9(%arg0: i32) -> (i32, i32) {
    %c0_i32 = arith.constant 0 : i32
    %c0_i32_0 = arith.constant 0 : i32
    %c0_i32_1 = arith.constant 0 : i32
    return %c0_i32, %c0_i32_0 : i32, i32
  }
  func.func @transform_10(%arg0: i32) -> (i32, i32) {
    %c0_i32 = arith.constant 0 : i32
    %c0_i32_0 = arith.constant 0 : i32
    %c0_i32_1 = arith.constant 0 : i32
    return %c0_i32, %c0_i32_0 : i32, i32
  }
  func.func @transform_11(%arg0: i32) -> (i32, i32) {
    %c0_i32 = arith.constant 0 : i32
    %c0_i32_0 = arith.constant 0 : i32
    return %arg0, %c0_i32 : i32, i32
  }
  func.func @transform_12(%arg0: i32) -> (i32, i32) {
    %c0_i32 = arith.constant 0 : i32
    %c0_i32_0 = arith.constant 0 : i32
    return %arg0, %c0_i32 : i32, i32
  }
}

</mosaic_0001>

<bundles_post_ra>
// kernel: tpu_custom_call.1
= control target key start
LH: loop header
LB: loop body
LE: loop exit
PB: predicated region body
PF: predicated region fallthrough
CT: control target
= control target key end

     0   :  { %s2020_s0 = inlined_call_operand.vmem [shape: f32[16,8], index: 0, kind: input, shape index: {}]   ;;  %s2021_s1 = inlined_call_operand.vmem [shape: f32[16,8], index: 1, kind: input, shape index: {}]   ;;  %s2022_s2 = inlined_call_operand.hbm [shape: bf16[8,128], index: 2, kind: input, shape index: {}]   ;;  %s2023_s3 = inlined_call_operand.hbm [shape: bf16[8,128], index: 3, kind: input, shape index: {}]   ;;  %s2024_s4 = inlined_call_operand.vmem [shape: f32[1,128], index: 4, kind: input, shape index: {}]   ;;  %s2025_s5 = inlined_call_operand.vmem [shape: bf16[128,128], index: 5, kind: input, shape index: {}]   ;;  %s2026_s6 = inlined_call_operand.vmem [shape: f32[1,128], index: 6, kind: input, shape index: {}]   ;;  %s2027_s7 = inlined_call_operand.hbm [shape: bf16[128,128], index: 7, kind: input, shape index: {}]   ;;  %s2028_s8 = inlined_call_operand.vmem [shape: f32[1,128], index: 8, kind: input, shape index: {}]   ;;  %s2029_s9 = inlined_call_operand.hbm [shape: bf16[128,128], index: 9, kind: input, shape index: {}]   ;;  %s2030_s10 = inlined_call_operand.vmem [shape: f32[1,128], index: 10, kind: input, shape index: {}]   ;;  %s2031_s11 = inlined_call_operand.hbm [shape: f32[16,128], index: 11, kind: output, shape index: {0}]   ;;  %s2032_s12 = inlined_call_operand.hbm [shape: f32[16,128], index: 12, kind: output, shape index: {1}]  }
   0x1   :  { %2042 = sst [smem:[#allocation24_spill]] %s2022_s2 }
   0x2   :  { %2043 = sst [smem:[#allocation25_spill]] %s2023_s3 }
   0x3   :  { %18 = vsyncpa [#allocation3], 0 }
   0x4   :  { %19 = vsyncpa [#allocation6], 0 }
   0x5   :  { %20 = vsyncpa [#allocation9], 0 }
   0x6   :  { %21 = vsyncpa [#allocation4], 0 }
   0x7   :  { %23 = vsyncpa [#allocation4 + $0x1], 0 }
   0x8   :  { %24 = vsyncpa [#allocation12], 0 }
   0x9   :  { %26 = vsyncpa [#allocation12 + $0x1], 0  ;;  %s1681_s21 = smov 0   ;;  %s1683_s22 = smov 0  }
   0xa   :  { %s1685_s23 = smov 0   ;;  %s1687_s24 = smov 0  }
   0xb LB: > { %2044 = sst [smem:[#allocation18_spill]] %s1592_s21  ;;  %s1702_s25 = sadd.s32 4294967295, %s1604_s24   ;;  %s1604_s24 = sphi %s1687_s24, %s2069_s24   ;;  %s1600_s23 = sphi %s1685_s23, %s2071_s23   ;;  %s1596_s22 = sphi %s1683_s22, %s2073_s22   ;;  %s1592_s21 = sphi %s1681_s21, %s2072_s21  }
   0xc   : > { %2045 = sst [smem:[#allocation19_spill]] %s1600_s23  ;;  %s1118_s26 = sadd.s32 4294967294, %s1604_s24  }
   0xd   : > { %2046 = sst [smem:[#allocation20_spill]] %s1604_s24  ;;  %s1706_s27 = sadd.s32 1, %s1604_s24  }
   0xe   : > { %2047 = sst [smem:[#allocation21_spill]] %s1706_s27  ;;  %s280_s28 = sadd.s32 1, %s1600_s23 }
   0xf   : > { %s277_s29 = ssub.s32 %s1604_s24, %s1706_s27  ;;  %p290_p0 = scmp.ne.s32.totalorder %s1600_s23, %s1596_s22 }
  0x10   : > { %p278_p1 = scmp.eq.s32.totalorder %s277_s29, 0  ;;  %p291_p2 = scmp.eq.s32.totalorder %s1702_s25, 1 }
  0x11   : > { %p296_p3 = scmp.ne.s32.totalorder %s1596_s22, %s1592_s21  ;;  %p297_p4 = scmp.eq.s32.totalorder %s1118_s26, 1 }
  0x12   : > { %s1717_s30 = scalar_select %p278_p1, %s1600_s23, %s280_s28  }
  0x13   : > { %p1719_p5 = por %p291_p2, %p290_p0  ;;  %p1723_p6 = por %p297_p4, %p296_p3 }
  0x14   : > { %2048 = sst [smem:[#allocation22_spill]] %s1717_s30  ;;  %p1119_p7 = scmp.ge.s32.totalorder %s1604_s24, 1 }
  0x15   : > { %s2049_s13 = scalar_select %p1719_p5, 1, 0 }
  0x16   : > { %s2050_s14 = scalar_select %p1723_p6, 1, 0 }
  0x17   : > { %p330_p8 = scmp.lt.s32.totalorder %s1604_s24, 3  ;;  %p2037_p9 = scmp.eq.s32.totalorder %s1702_s25, 0 }
  0x18   : > { %2051 = sst [smem:[#allocation23_spill]] %s2050_s14  ;;  %s1606_s16 = smov [#allocation5]  }
  0x19   : > { %p1730_p10 = pnand %p1119_p7, %p330_p8  ;;  %s354_s17 = sshll.u32 %s1606_s16, 4  ;;  %s355_s17 = int_to_ptr.vmem [resolvable:$true] %s354_s17 }
  0x1a   : > { %s1607_s18 = smov [#allocation2]   ;;  %s1608_s26 = smov [#allocation7]  }
  0x1b   : > { %s2052_s15 = scalar_select %p1730_p10, 1, 0 }
  0x1c   : > { %p1293_p11 = pneg %p1730_p10  ;;  %s343_s19 = sshll.u32 %s1607_s18, 4  ;;  %s1742_s19 = int_to_ptr.vmem [resolvable:$true] %s343_s19 }
  0x1d   : > { %s373_s28 = sshll.u32 %s1608_s26, 4  ;;  %s2054_s3 = sld [smem:[#allocation25_spill]]  ;;  %s1744_s28 = int_to_ptr.vmem [resolvable:$true] %s373_s28 }
  0x1e   : > { %p1738_p12 = pnand %p2037_p9, %p1293_p11 }
  0x20   : > { %p1754_p0 = pneg %p1738_p12 }
  0x23   : > { %s1386_s16 = scalar_lea.hbm %s2054_s3, 64 }
  0x24   : > { %p1387_p13 = scmp.ne.s32.totalorder %s2054_s3, %s1386_s16  ;;  %p1393_p3 = scmp.lt.u32.totalorder %s1386_s16, %s2054_s3 }
  0x26   : > { %p1389_p1 = pnand %p1754_p0, %p1387_p13 }
  0x28   : > { %p1390_p2 = pneg %p1389_p1 }
  0x2a   : > { %p1395_p4 = pnand %p1393_p3, %p1390_p2 }
  0x2c   : > { %1398 = shalt.err (!%p1395_p4)
}
  0x2d   : > { %s1399_s30 = scalar_lea.vmem %s355_s17, 64  ;;  %p1407_p9 = scmp.lt.s32.totalorder %s355_s17, %s355_s17 }
  0x2e   : > { %p1400_p7 = scmp.ne.s32.totalorder %s355_s17, %s1399_s30  ;;  %p1408_p6 = scmp.lt.s32.totalorder %s1399_s30, %s1399_s30 }
  0x30   : > { %p1402_p8 = pnand %p1400_p7, %p1754_p0  ;;  %p1409_p5 = por %p1408_p6, %p1407_p9 }
  0x32   : > { %p1403_p11 = pneg %p1402_p8 }
  0x34   : > { %p1410_p10 = pnand %p1409_p5, %p1403_p11 }
  0x36   : > { %1413 = shalt.err (!%p1410_p10)
}
  0x37   : > { %1299 = dma.hbm_to_vmem [thread:$0]  (!%p1738_p12), %s2054_s3, 64, %s355_s17, [#allocation6]  }
  0x38   : > { %s2056_s2 = sld [smem:[#allocation24_spill]] }
  0x3e   : > { %s1414_s16 = scalar_lea.hbm %s2056_s2, 64 }
  0x3f   : > { %p1415_p13 = scmp.ne.s32.totalorder %s2056_s2, %s1414_s16  ;;  %p1421_p5 = scmp.lt.u32.totalorder %s1414_s16, %s2056_s2 }
  0x41   : > { %p1417_p1 = pnand %p1415_p13, %p1754_p0 }
  0x43   : > { %p1418_p6 = pneg %p1417_p1 }
  0x45   : > { %p1423_p9 = pnand %p1421_p5, %p1418_p6 }
  0x47   : > { %1426 = shalt.err (!%p1423_p9)
}
  0x48   : > { %s1427_s17 = scalar_lea.vmem %s1742_s19, 64  ;;  %p1435_p4 = scmp.lt.s32.totalorder %s1742_s19, %s1742_s19 }
  0x49   : > { %p1428_p10 = scmp.ne.s32.totalorder %s1742_s19, %s1427_s17  ;;  %p1436_p7 = scmp.lt.s32.totalorder %s1427_s17, %s1427_s17 }
  0x4b   : > { %p1430_p2 = pnand %p1428_p10, %p1754_p0  ;;  %p1437_p8 = por %p1436_p7, %p1435_p4 }
  0x4d   : > { %p1431_p3 = pneg %p1430_p2 }
  0x4f   : > { %p1438_p11 = pnand %p1437_p8, %p1431_p3 }
  0x51   : > { %1441 = shalt.err (!%p1438_p11)
}
  0x52   : > { %1296 = dma.hbm_to_vmem [thread:$0]  (!%p1738_p12), %s2056_s2, 64, %s1742_s19, [#allocation3]  }
  0x53   : > { %s1442_s14 = scalar_lea.hbm %s2027_s7, 1024 }
  0x54   : > { %p1443_p13 = scmp.ne.s32.totalorder %s2027_s7, %s1442_s14  ;;  %p1449_p5 = scmp.lt.u32.totalorder %s1442_s14, %s2027_s7 }
  0x56   : > { %p1445_p1 = pnand %p1443_p13, %p1754_p0 }
  0x58   : > { %p1446_p6 = pneg %p1445_p1 }
  0x5a   : > { %p1451_p9 = pnand %p1449_p5, %p1446_p6 }
  0x5c   : > { %1454 = shalt.err (!%p1451_p9)
}
  0x5d   : > { %s1455_s19 = scalar_lea.vmem %s1744_s28, 1024  ;;  %p1463_p4 = scmp.lt.s32.totalorder %s1744_s28, %s1744_s28 }
  0x5e   : > { %p1456_p10 = scmp.ne.s32.totalorder %s1744_s28, %s1455_s19  ;;  %p1464_p7 = scmp.lt.s32.totalorder %s1455_s19, %s1455_s19 }
  0x60   : > { %p1458_p2 = pnand %p1456_p10, %p1754_p0  ;;  %p1465_p8 = por %p1464_p7, %p1463_p4 }
  0x62   : > { %p1459_p3 = pneg %p1458_p2 }
  0x64   : > { %p1466_p11 = pnand %p1465_p8, %p1459_p3 }
  0x66   : > { %1469 = shalt.err (!%p1466_p11)
}
  0x67   : > { %s1609_s17 = smov 64   ;;  %s1610_s21 = smov 4  }
  0x68   : > { %1302 = dma.hbm_to_vmem [thread:$0]  (!%p1738_p12), %s2027_s7, 1024, %s1744_s28, [#allocation6], %s1609_s17, %s1609_s17, %s1610_s21  }
  0x69   : > { %s1611_s27 = smov [#allocation8]   ;;  %s1470_s26 = scalar_lea.hbm %s2029_s9, 1024 }
  0x6a   : > { %s389_s14 = sshll.u32 %s1611_s27, 4  ;;  %p1471_p13 = scmp.ne.s32.totalorder %s2029_s9, %s1470_s26  ;;  %s390_s14 = int_to_ptr.vmem [resolvable:$true] %s389_s14 }
  0x6b   : > { %p1477_p5 = scmp.lt.u32.totalorder %s1470_s26, %s2029_s9 }
  0x6c   : > { %p1473_p1 = pnand %p1471_p13, %p1754_p0 }
  0x6e   : > { %p1474_p6 = pneg %p1473_p1 }
  0x70   : > { %p1479_p9 = pnand %p1477_p5, %p1474_p6 }
  0x72   : > { %1482 = shalt.err (!%p1479_p9)
}
  0x73   : > { %s1483_s28 = scalar_lea.vmem %s390_s14, 1024  ;;  %p1491_p4 = scmp.lt.s32.totalorder %s390_s14, %s390_s14 }
  0x74   : > { %p1484_p10 = scmp.ne.s32.totalorder %s390_s14, %s1483_s28  ;;  %p1492_p7 = scmp.lt.s32.totalorder %s1483_s28, %s1483_s28 }
  0x76   : > { %p1486_p2 = pnand %p1484_p10, %p1754_p0  ;;  %p1493_p8 = por %p1492_p7, %p1491_p4 }
  0x78   : > { %p1487_p3 = pneg %p1486_p2 }
  0x7a   : > { %p1494_p11 = pnand %p1493_p8, %p1487_p3 }
  0x7c   : > { %1497 = shalt.err (!%p1494_p11)
}
  0x7d   : > { %1305 = dma.hbm_to_vmem [thread:$0]  (!%p1738_p12), %s2029_s9, 1024, %s390_s14, [#allocation9], %s1609_s17, %s1609_s17, %s1610_s21  }
  0x7e   : > { %p2057_p13 = scmp.ne.s32.totalorder %s2052_s15, 0 }
  0x7f   : > { %p2058_p1 = scmp.eq.s32.totalorder (!%p2057_p13), %s1702_s25, 0 }
  0x80   : > { %422 = sbr.rel (%p2057_p13) target bundleno = 849 (0x351), region = 64 }
  0x87   : > { %1571 = dma.done.wait (%p2058_p1), [#allocation3], 64   ;;  %p2059_p0 = pmov %p2058_p1 }
  0x89   : > { %1573 = vsyncadd (%p2059_p0), [#allocation3], 4294967232  ;;  %p2060_p6 = pmov %p2059_p0 }
  0x8a   : > { %p2061_p5 = pmov %p2059_p0 }
  0x8b   : > { %1575 = dma.done.wait (%p2060_p6), [#allocation6], 1088  }
  0x8c   : > { %1577 = vsyncadd (%p2061_p5), [#allocation6], 4294966208  ;;  %p2062_p9 = pmov %p2059_p0 }
  0x8d   : > { %p2063_p12 = pmov %p2059_p0 }
  0x8e   : > { %1579 = dma.done.wait (%p2062_p9), [#allocation9], 1024  }
  0x8f   : > { %1581 = vsyncadd (%p2063_p12), [#allocation9], 4294966272  ;;  %p484_p10 = scmp.lt.s32.totalorder %s1702_s25, 1  ;;  %v1612_v0 = vmov 0.0   ;;  %vm1613_vm0 = vmmov 0   ;;  %vm503_vm1 = vcmask 1043456  }
  0x90   : > { %1201 = vmatprep.subr.bf16.mxu1 %v1612_v0  ;;  %1203 = vmatprep.mubr.msk.bf16.mxu1 %vm1613_vm0, %v1612_v0  ;;  %v497_v1 = vld [vmem:[#allocation2] sm:$0xf]  ;;  %v498_v2 = vld [vmem:[#allocation5] sm:$0xf]  ;;  %vm499_vm2 = vcmask 64512   ;;  %v1363_v8 = vld [vmem:[%s2025_s5 + $0x8] sm:$0xff]  }
  0x91   : > { %s485_s2 = scalar_select %p484_p10, %s1702_s25, 1  ;;  %1213 = vmatprep.subr.bf16.mxu0 %v1612_v0  ;;  %1229 = vmatprep.mubr.msk.bf16.mxu0 %vm1613_vm0, %v1612_v0  ;;  %v505_v3 = vsel %vm503_vm1, %v498_v2, 0  ;;  %v1362_v5 = vld [vmem:[%s2025_s5] sm:$0xff]   ;;  %v551_v7 = vsel %vm503_vm1, %v497_v1, 0  ;;  %v1364_v10 = vld [vmem:[%s2025_s5 + $0x10] sm:$0xff]   ;;  %v1365_v12 = vld [vmem:[%s2025_s5 + $0x18] sm:$0xff]  }
  0x92   : > { %1202 = vmatpush3.bf16.msra.mxu1 %v505_v3  ;;  %1214 = vmatpush3.bf16.msra.mxu0 %v1362_v5  ;;  %v1366_v13 = vld [vmem:[%s2025_s5 + $0x20] sm:$0xff]   ;;  %v1367_v14 = vld [vmem:[%s2025_s5 + $0x28] sm:$0xff]   ;;  %v1368_v15 = vld [vmem:[%s2025_s5 + $0x30] sm:$0xff]   ;;  %s1925_s26 = sand.u32 1, %s1596_s22   ;;  %p2064_p3 = scmp.ne.s32.totalorder %s2049_s13, 0 }
  0x93   : > { %s1132_s3 = sshll.u32 %s485_s2, 3  ;;  %1207 = vmatprep.subr.bf16.mxu1 %v1612_v0  ;;  %1215 = vmatprep.subr.bf16.mxu0 %v1612_v0  ;;  %v1369_v16 = vld [vmem:[%s2025_s5 + $0x38] sm:$0xff]   ;;  %v1370_v17 = vld [vmem:[#allocation7] sm:$0xff]   ;;  %v1372_v18 = vld [vmem:[#allocation7 + $0x8] sm:$0xff]   ;;  %s1130_s30 = sshll.u32 %s1925_s26, 3 }
  0x94   : > { %s491_s18 = scalar_lea.vmem %s2021_s1, %s1132_s3  ;;  %s487_s27 = scalar_lea.vmem %s2020_s0, %s1132_s3  ;;  %v1374_v19 = vld [vmem:[#allocation7 + $0x10] sm:$0xff]   ;;  %v1376_v20 = vld [vmem:[#allocation7 + $0x18] sm:$0xff]   ;;  %v1378_v21 = vld [vmem:[#allocation7 + $0x20] sm:$0xff]  }
  0x95   : > { %v495_v4 = vld [vmem:[%s491_s18] sm:$0xff]  ;;  %v1380_v22 = vld [vmem:[#allocation7 + $0x28] sm:$0xff]   ;;  %v1371_v35 = vld [vmem:[#allocation8] sm:$0xff]   ;;  %s1166_s2 = sshll.u32 %s1702_s25, 7  ;;  %s476_s3 = scalar_lea.vmem [#allocation10], %s1130_s30 }
  0x96   : > { %v496_v6 = vpack.c.bf16 %v495_v4, %v495_v4  ;;  %v493_v9 = vld [vmem:[%s487_s27] sm:$0xff]  ;;  %1216 = vmatpush3.bf16.msra.mxu0 %v1363_v8  ;;  %v1373_v37 = vld [vmem:[#allocation8 + $0x8] sm:$0xff]   ;;  %v1375_v38 = vld [vmem:[#allocation8 + $0x10] sm:$0xff]   ;;  %s961_s15 = sshll.u32 %s476_s3, 4  ;;  %s1940_s17 = scalar_lea.hbm %s2031_s11, %s1166_s2  ;;  %s1942_s15 = int_to_ptr.vmem [resolvable:$true] %s961_s15 }
  0x97   : > { %1217 = vmatprep.subr.bf16.mxu0 %v1612_v0  ;;  %v494_v11 = vpack.c.bf16 %v493_v9, %v493_v9  ;;  %v1136_v28 = vld [vmem:[%s2024_s4] ss:$0 sm:$0xff]  ;;  %v1379_v40 = vld [vmem:[#allocation8 + $0x20] sm:$0xff]   ;;  %v1381_v41 = vld [vmem:[#allocation8 + $0x28] sm:$0xff]   ;;  %s1944_s21 = scalar_lea.vmem [#allocation11], %s1130_s30  ;;  %s943_s14 = scalar_lea.sflag [#allocation4], %s1925_s26 }
  0x98   : > { %1204 = vmatmul.mubr.msk.bf16.vlgmr.msra.gmra.mrb[0].mxu1 %vm499_vm2, %v496_v6  ;;  %v1377_v39 = vld [vmem:[#allocation8 + $0x18] sm:$0xff]   ;;  %v1382_v42 = vld [vmem:[#allocation7 + $0x30] sm:$0xff]   ;;  %s974_s27 = sshll.u32 %s1944_s21, 4  ;;  %s1498_s29 = scalar_lea.vmem %s1942_s15, 128  ;;  %s1978_s27 = int_to_ptr.vmem [resolvable:$true] %s974_s27 }
  0x99   : > { %1208 = vmatpush3.bf16.msra.mxu1 %v551_v7  ;;  %1209 = vmatprep.mubr.msk.bf16.mxu1 %vm1613_vm0, %v1612_v0  ;;  %v1383_v43 = vld [vmem:[#allocation8 + $0x30] sm:$0xff]   ;;  %v1384_v44 = vld [vmem:[#allocation7 + $0x38] sm:$0xff]   ;;  %p1499_p2 = scmp.ne.s32.totalorder %s1942_s15, %s1498_s29  ;;  %s1614_s16 = smov [#allocation10]  }
  0x9a   : > { %1233 = vmatprep.subr.bf16.mxu1 %v1612_v0  ;;  %1218 = vmatpush3.bf16.msra.mxu0 %v1364_v10  ;;  %v1385_v45 = vld [vmem:[#allocation8 + $0x38] sm:$0xff]   ;;  %s1502_s19 = sshll.u32 %s1614_s16, 4  ;;  %s1503_s19 = int_to_ptr.vmem [resolvable:$false] %s1502_s19 }
  0x9b   : > { %1219 = vmatprep.subr.bf16.mxu0 %v1612_v0  ;;  %v1137_v46 = vld [vmem:[%s2026_s6] ss:$0 sm:$0xff]  ;;  %p1500_p4 = pnand %p1499_p2, %p2064_p3  ;;  %s1504_s28 = scalar_lea.vmem %s1503_s19, 256 }
  0x9c   : > { %v1146_v54 = vld [vmem:[%s2028_s8] ss:$0 sm:$0xff]  ;;  %p1505_p8 = scmp.lt.s32.totalorder %s1942_s15, %s1503_s19  ;;  %p1506_p11 = scmp.lt.s32.totalorder %s1504_s28, %s1498_s29 }
  0x9d   : > { %v1155_v55 = vld [vmem:[%s2030_s10] ss:$0 sm:$0xff]  ;;  %p1501_p7 = pneg %p1500_p4 }
  0x9e   : > { %1220 = vmatpush3.bf16.msra.mxu0 %v1365_v12  ;;  %p1507_p13 = por %p1506_p11, %p1505_p8 }
  0x9f   : > { %1221 = vmatprep.subr.bf16.mxu0 %v1612_v0 }
  0xa0   : > { %1210 = vmatmul.mubr.msk.bf16.vlgmr.msra.gmra.mrb[4].mxu1 %vm499_vm2, %v494_v11  ;;  %p1508_p1 = pnand %p1507_p13, %p1501_p7 }
  0xa1   : > { %1249 = vmatprep.mubr.msk.bf16.mxu1 %vm1613_vm0, %v1612_v0  ;;  %1234 = vmatpush3.bf16.msra.mxu1 %v1370_v17 }
  0xa2   : > { %1222 = vmatpush3.bf16.msra.mxu0 %v1366_v13  ;;  %1235 = vmatprep.subr.bf16.mxu1 %v1612_v0 }
  0xa3   : > { %1223 = vmatprep.subr.bf16.mxu0 %v1612_v0 }
  0xa5   : > { %1236 = vmatpush3.bf16.msra.mxu1 %v1372_v18 }
  0xa6   : > { %1224 = vmatpush3.bf16.msra.mxu0 %v1367_v14  ;;  %1237 = vmatprep.subr.bf16.mxu1 %v1612_v0 }
  0xa7   : > { %1225 = vmatprep.subr.bf16.mxu0 %v1612_v0 }
  0xa9   : > { %1238 = vmatpush3.bf16.msra.mxu1 %v1374_v19 }
  0xaa   : > { %1226 = vmatpush3.bf16.msra.mxu0 %v1368_v15  ;;  %1239 = vmatprep.subr.bf16.mxu1 %v1612_v0 }
  0xab   : > { %1227 = vmatprep.subr.bf16.mxu0 %v1612_v0 }
  0xad   : > { %1240 = vmatpush3.bf16.msra.mxu1 %v1376_v20 }
  0xae   : > { %1228 = vmatpush3.bf16.msra.mxu0 %v1369_v16  ;;  %1241 = vmatprep.subr.bf16.mxu1 %v1612_v0 }
  0xaf   : > { %1253 = vmatprep.subr.bf16.mxu0 %v1612_v0 }
  0xb1   : > { %1242 = vmatpush3.bf16.msra.mxu1 %v1378_v21 }
  0xb2   : > { %1243 = vmatprep.subr.bf16.mxu1 %v1612_v0 }
  0xb5   : > { %1244 = vmatpush3.bf16.msra.mxu1 %v1380_v22 }
  0xb6   : > { %1245 = vmatprep.subr.bf16.mxu1 %v1612_v0 }
  0xb9   : > { %1246 = vmatpush3.bf16.msra.mxu1 %v1382_v42 }
  0xba   : > { %1247 = vmatprep.subr.bf16.mxu1 %v1612_v0 }
  0xbd   : > { %1248 = vmatpush3.bf16.msra.mxu1 %v1384_v44 }
 0x16b   : > { %v541_v23 = vpop.f32.mrb[0].mxu1 }
 0x16c   : > { %v1205_v24 = vpop.f32.mrb[1].mxu1 }
 0x16d   : > { %v544_v25 = vpop.f32.mrb[2].mxu1 }
 0x16e   : > { %v1206_v26 = vpop.f32.mrb[3].mxu1 }
 0x173   : > { %v587_v27 = vpop.f32.mrb[4].mxu1 }
 0x174   : > { %v588_v29 = vadd.f32 %v587_v27, %v541_v23  ;;  %v1211_v30 = vpop.f32.mrb[5].mxu1 }
 0x175   : > { %v590_v31 = vpop.f32.mrb[6].mxu1 }
 0x176   : > { %v600_v32 = vadd.f32 %v1136_v28, %v588_v29  ;;  %v1212_v33 = vpop.f32.mrb[7].mxu1 }
 0x178   : > { %v601_v34 = vmax.f32 %v600_v32, 0.0 }
 0x17a   : > { %v602_v36 = vpack.c.bf16 %v601_v34, %v601_v34 }
 0x17c   : > { %1230 = vmatmul.mubr.bf16.vlgmr.msra.gmra.mrb[0].mxu0 %v602_v36 }
 0x17d   : > { %1254 = vmatpush3.bf16.msra.mxu0 %v1371_v35  ;;  %1269 = vmatprep.mubr.msk.bf16.mxu0 %vm1613_vm0, %v1612_v0 }
 0x17e   : > { %1255 = vmatprep.subr.bf16.mxu0 %v1612_v0 }
 0x181   : > { %1256 = vmatpush3.bf16.msra.mxu0 %v1373_v37 }
 0x182   : > { %1257 = vmatprep.subr.bf16.mxu0 %v1612_v0 }
 0x185   : > { %1258 = vmatpush3.bf16.msra.mxu0 %v1375_v38 }
 0x186   : > { %1259 = vmatprep.subr.bf16.mxu0 %v1612_v0 }
 0x189   : > { %1260 = vmatpush3.bf16.msra.mxu0 %v1377_v39 }
 0x18a   : > { %1261 = vmatprep.subr.bf16.mxu0 %v1612_v0 }
 0x18d   : > { %1262 = vmatpush3.bf16.msra.mxu0 %v1379_v40 }
 0x18e   : > { %1263 = vmatprep.subr.bf16.mxu0 %v1612_v0 }
 0x191   : > { %1264 = vmatpush3.bf16.msra.mxu0 %v1381_v41 }
 0x192   : > { %1265 = vmatprep.subr.bf16.mxu0 %v1612_v0 }
 0x195   : > { %1266 = vmatpush3.bf16.msra.mxu0 %v1383_v43 }
 0x196   : > { %1267 = vmatprep.subr.bf16.mxu0 %v1612_v0 }
 0x199   : > { %1268 = vmatpush3.bf16.msra.mxu0 %v1385_v45 }
 0x24f   : > { %v708_v47 = vpop.f32.mrb[0].mxu0 }
 0x250   : > { %v709_v48 = vadd.f32 %v1137_v46, %v708_v47  ;;  %v1231_v49 = vpop.f32.mrb[1].mxu0 }
 0x251   : > { %v711_v50 = vpop.f32.mrb[2].mxu0 }
 0x252   : > { %v714_v51 = vmax.f32 %v709_v48, 0.0  ;;  %v1232_v52 = vpop.f32.mrb[3].mxu0 }
 0x254   : > { %v715_v53 = vpack.c.bf16 %v714_v51, %v714_v51 }
 0x256   : > { %1250 = vmatmul.mubr.bf16.vlgmr.msra.gmra.mrb[8].mxu1 %v715_v53  ;;  %1270 = vmatmul.mubr.bf16.vlgmr.msra.gmra.mrb[4].mxu0 %v715_v53 }
 0x329   : > { %v821_v56 = vpop.f32.mrb[8].mxu1  ;;  %v932_v57 = vpop.f32.mrb[4].mxu0 }
 0x32a   : > { %v822_v58 = vadd.f32 %v1146_v54, %v821_v56  ;;  %v933_v59 = vadd.f32 %v1155_v55, %v932_v57  ;;  %v1251_v60 = vpop.f32.mrb[9].mxu1  ;;  %v1271_v61 = vpop.f32.mrb[5].mxu0 }
 0x32b   : > { %v824_v62 = vpop.f32.mrb[10].mxu1  ;;  %v935_v63 = vpop.f32.mrb[6].mxu0 }
 0x32c   : > { %940 = vst [vmem:[%s476_s3] sm:$0xff] %v822_v58  ;;  %v938_v0 = vmax.f32 %v933_v59, -20.0  ;;  %v1252_v1 = vpop.f32.mrb[11].mxu1  ;;  %v1272_v2 = vpop.f32.mrb[7].mxu0 }
 0x32d   : > { %1511 = shalt.err (!%p1508_p1)
}
 0x32e   : > { %s1512_s30 = scalar_lea.hbm %s1940_s17, 128  ;;  %s1516_s3 = scalar_lea.hbm %s2031_s11, 256 }
 0x32f   : > { %p1513_p0 = scmp.ne.s32.totalorder %s1940_s17, %s1512_s30  ;;  %p1517_p9 = scmp.lt.u32.totalorder %s1940_s17, %s2031_s11 }
 0x330   : > { %p1518_p12 = scmp.lt.u32.totalorder %s1516_s3, %s1512_s30  ;;  %p1520_p2 = scmp.lt.u32.totalorder %s1512_s30, %s1940_s17 }
 0x331   : > { %p1514_p6 = pnand %p1513_p0, %p2064_p3 }
 0x332   : > { %p1519_p10 = por %p1518_p12, %p1517_p9 }
 0x333   : > { %p1515_p5 = pneg %p1514_p6 }
 0x334   : > { %p1521_p4 = por %p1520_p2, %p1519_p10 }
 0x336   : > { %p1522_p7 = pnand %p1521_p4, %p1515_p5 }
 0x338   : > { %1525 = shalt.err (!%p1522_p7)
}
 0x339   : > { %1289 = dma.vmem_to_hbm [thread:$0]  (%p2064_p3), %s1942_s15, 128, %s1940_s17, %s943_s14   ;;  %v939_v3 = vmin.f32 %v938_v0, 2.0 }
 0x33a   : > { %s1974_s19 = scalar_lea.hbm %s2032_s12, %s1166_s2  ;;  %s948_s28 = scalar_lea.sflag [#allocation12], %s1925_s26 }
 0x33b   : > { %941 = vst [vmem:[%s1944_s21] sm:$0xff] %v939_v3  ;;  %s1526_s30 = scalar_lea.vmem %s1978_s27, 128  ;;  %s1615_s15 = smov [#allocation11]  }
 0x33c   : > { %p1527_p8 = scmp.ne.s32.totalorder %s1978_s27, %s1526_s30  ;;  %s1530_s25 = sshll.u32 %s1615_s15, 4  ;;  %s1531_s25 = int_to_ptr.vmem [resolvable:$false] %s1530_s25 }
 0x33d   : > { %s1532_s17 = scalar_lea.vmem %s1531_s25, 256  ;;  %p1533_p1 = scmp.lt.s32.totalorder %s1978_s27, %s1531_s25 }
 0x33e   : > { %p1528_p11 = pnand %p1527_p8, %p2064_p3  ;;  %p1534_p0 = scmp.lt.s32.totalorder %s1532_s17, %s1526_s30 }
 0x340   : > { %p1529_p13 = pneg %p1528_p11  ;;  %p1535_p6 = por %p1534_p0, %p1533_p1 }
 0x342   : > { %p1536_p5 = pnand %p1535_p6, %p1529_p13 }
 0x344   : > { %1539 = shalt.err (!%p1536_p5)
}
 0x345   : > { %s1540_s26 = scalar_lea.hbm %s1974_s19, 128  ;;  %s1544_s14 = scalar_lea.hbm %s2032_s12, 256 }
 0x346   : > { %p1541_p9 = scmp.ne.s32.totalorder %s1974_s19, %s1540_s26  ;;  %p1545_p2 = scmp.lt.u32.totalorder %s1974_s19, %s2032_s12 }
 0x347   : > { %p1546_p4 = scmp.lt.u32.totalorder %s1544_s14, %s1540_s26  ;;  %p1548_p8 = scmp.lt.u32.totalorder %s1540_s26, %s1974_s19 }
 0x348   : > { %p1542_p12 = pnand %p1541_p9, %p2064_p3 }
 0x349   : > { %p1547_p7 = por %p1546_p4, %p1545_p2 }
 0x34a   : > { %p1543_p10 = pneg %p1542_p12 }
 0x34b   : > { %p1549_p11 = por %p1548_p8, %p1547_p7 }
 0x34d   : > { %p1550_p13 = pnand %p1549_p11, %p1543_p10 }
 0x34f   : > { %1553 = shalt.err (!%p1550_p13)
}
 0x350   : > { %1290 = dma.vmem_to_hbm [thread:$0]  (%p2064_p3), %s1978_s27, 128, %s1974_s19, %s948_s28  }
 0x351 PF: > { %s2065_s3 = sld [smem:[#allocation20_spill]]  ;;  %s2066_s20 = sld [smem:[#allocation18_spill]] }
 0x352   : > { %s2067_s18 = sld [smem:[#allocation23_spill]] }
 0x357   : > { %p1321_p1 = scmp.ge.s32.totalorder %s2065_s3, 2  ;;  %s986_s29 = sand.u32 1, %s2066_s20  }
 0x358   : > { %p2068_p0 = scmp.ne.s32.totalorder %s2067_s18, 0  ;;  %s987_s16 = scalar_lea.sflag [#allocation4], %s986_s29 }
 0x35a   : > { %p1307_p6 = pnand %p1321_p1, %p2068_p0 }
 0x35c   : > { %1583 = dma.done.wait (!%p1307_p6), %s987_s16, 128  }
 0x35d   : > { %1585 = vsyncadd (!%p1307_p6), %s987_s16, 4294967168  ;;  %s996_s30 = scalar_lea.sflag [#allocation12], %s986_s29 }
 0x35e   : > { %1587 = dma.done.wait (!%p1307_p6), %s996_s30, 128  }
 0x35f   : > { %1589 = vsyncadd (!%p1307_p6), %s996_s30, 4294967168  ;;  %s2069_s24 = sld [smem:[#allocation21_spill]]  ;;  %s2070_s13 = sld [smem:[#allocation19_spill]] }
 0x360   : > { %s2071_s23 = sld [smem:[#allocation22_spill]]  ;;  %s2072_s21 = smov %s1596_s22 }
 0x365   : > { %p29_p3 = scmp.ge.s32.totalorder %s2069_s24, 4   ;;  %s2073_s22 = smov %s2070_s13 }
 0x367   :  { %31 = sbr.rel (!%p29_p3) target bundleno = 11 (0xb), region = 136 }
 0x36e   :  { %1001 = vsyncpa [#allocation3], 1 }
 0x36f   :  { %1003 = vsyncpa [#allocation3 + $0x1], 1 }
 0x370   :  { %1004 = vsyncpa [#allocation6], 1 }
 0x371   :  { %1005 = vsyncpa [#allocation9], 1 }
 0x372   :  { %1006 = vsyncpa [#allocation4], 1 }
 0x373   :  { %1008 = vsyncpa [#allocation4 + $0x1], 1 }
 0x374   :  { %1009 = vsyncpa [#allocation12], 1 }
 0x375   :  { %1011 = vsyncpa [#allocation12 + $0x1], 1 }

</bundles_post_ra>
